<compile_context>
chip_gen: v6e
topology: v6e:2x2x1
jax: 0.10.0
libtpu: 0.0.40
codegen_flags: <defaults>
</compile_context>

<pallas_src>
import functools

import jax
import jax.numpy as jnp
from jax.experimental import pallas as pl
from jax.experimental.pallas import tpu as pltpu


def _conv3x3_bn_relu_kernel(x_ref, w_ref, scale_ref, shift_ref, o_ref, stack_ref,
                            *, H, W, C_in):
    """One batch element per grid step.

    x_ref:     (1, C_in, HWp)   flat spatial, zero-padded (>= W+1 each side, lane aligned)
    w_ref:     (C_out, 9*C_in)  tap-stacked weights; column t*C_in + i, t = (ky+1)*3+(kx+1)
    scale_ref: (C_out, 1)       gamma / sqrt(var + eps)
    shift_ref: (C_out, 1)       beta - mean * scale
    o_ref:     (1, C_out, H*W)  lane-dense output
    stack_ref: (9*C_in, H*W)    VMEM scratch: tap-stacked shifted input
    """
    HW = H * W
    PAD = W + 1

    # Column index of every flat output position (for masking horizontal wrap).
    col = jax.lax.broadcasted_iota(jnp.int32, (1, HW), 1) % W
    left_ok = col >= 1          # valid positions for kx = -1 taps
    right_ok = col <= W - 2     # valid positions for kx = +1 taps

    # Build the tap-stacked input: 9 statically shifted (C_in, HW) views.
    t = 0
    for ky in (-1, 0, 1):
        for kx in (-1, 0, 1):
            start = PAD + ky * W + kx                       # static lane offset
            xs = x_ref[0, :, start:start + HW]              # (C_in, HW) shifted view
            # Vertical out-of-bounds taps land in the zero padding of the flat axis;
            # only horizontal wrap-around needs masking.
            if kx == -1:
                xs = jnp.where(left_ok, xs, 0.0)
            elif kx == 1:
                xs = jnp.where(right_ok, xs, 0.0)
            stack_ref[t * C_in:(t + 1) * C_in, :] = xs.astype(jnp.float32)
            t += 1

    # Single fused MXU matmul: (C_out, 9*C_in) @ (9*C_in, HW).
    acc = jnp.dot(w_ref[...], stack_ref[...], preferred_element_type=jnp.float32)

    y = acc * scale_ref[...] + shift_ref[...]               # fused BatchNorm (eval) affine
    o_ref[0] = jnp.maximum(y, 0.0).astype(o_ref.dtype)      # ReLU


def conv_block_forward(x, weight, gamma, beta, running_mean, running_var, eps=1e-5):
    """ConvBlock forward: conv3x3(pad=1, bias=False) -> BN2d(eval) -> ReLU. NCHW in/out."""
    N, C_in, H, W = x.shape
    C_out = weight.shape[0]
    HW = H * W
    PAD = W + 1
    # Lane-align the padded flat length (multiple of 128) for clean DMA / vector loads.
    HWp = ((HW + 2 * PAD + 127) // 128) * 128
    pad_right = HWp - HW - PAD          # >= PAD by construction

    # NCHW stays NCHW: flatten spatial (free reshape) and zero-pad the flat axis so
    # every 3x3 tap becomes a static lane-offset slice inside the kernel.
    x_flat = x.reshape(N, C_in, HW)
    x_pad = jnp.pad(x_flat, ((0, 0), (0, 0), (PAD, pad_right)))

    # (C_out, C_in, 3, 3) -> (C_out, 9*C_in) with column order (t, i), t = ky_idx*3 + kx_idx.
    w_big = jnp.transpose(weight, (0, 2, 3, 1)).reshape(C_out, 9 * C_in).astype(jnp.float32)

    # Fold BN (eval mode) into per-channel scale/shift.
    inv_std = jax.lax.rsqrt(running_var.astype(jnp.float32) + eps)
    scale = (gamma * inv_std).reshape(C_out, 1).astype(jnp.float32)
    shift = (beta - running_mean * gamma * inv_std).reshape(C_out, 1).astype(jnp.float32)

    kernel = functools.partial(_conv3x3_bn_relu_kernel, H=H, W=W, C_in=C_in)

    itemsize = x.dtype.itemsize
    flops = 2 * N * HW * 9 * C_in * C_out + 3 * N * HW * C_out
    bytes_accessed = (x_pad.size + w_big.size + scale.size + shift.size
                      + N * C_out * HW) * itemsize

    out_flat = pl.pallas_call(
        kernel,
        out_shape=jax.ShapeDtypeStruct((N, C_out, HW), x.dtype),
        grid_spec=pltpu.PrefetchScalarGridSpec(
            num_scalar_prefetch=0,
            grid=(N,),
            in_specs=[
                pl.BlockSpec((1, C_in, HWp), lambda n: (n, 0, 0)),     # streamed per batch
                pl.BlockSpec((C_out, 9 * C_in), lambda n: (0, 0)),     # resident weights
                pl.BlockSpec((C_out, 1), lambda n: (0, 0)),            # resident BN scale
                pl.BlockSpec((C_out, 1), lambda n: (0, 0)),            # resident BN shift
            ],
            out_specs=pl.BlockSpec((1, C_out, HW), lambda n: (n, 0, 0)),
            scratch_shapes=[pltpu.VMEM((9 * C_in, HW), jnp.float32)],
        ),
        compiler_params=pltpu.CompilerParams(
            dimension_semantics=("parallel",),
        ),
        cost_estimate=pl.CostEstimate(
            flops=flops, transcendentals=0, bytes_accessed=bytes_accessed),
    )(x_pad, w_big, scale, shift)

    # (N, C_out, H*W) -> (N, C_out, H, W): contiguous reshape, no transpose.
    return out_flat.reshape(N, C_out, H, W)


def _reference(x, weight, gamma, beta, running_mean, running_var, eps=1e-5):
    y = jax.lax.conv_general_dilated(
        x, weight, window_strides=(1, 1), padding=((1, 1), (1, 1)),
        dimension_numbers=("NCHW", "OIHW", "NCHW"))
    inv_std = jax.lax.rsqrt(running_var + eps)
    y = (y - running_mean[None, :, None, None]) * (gamma * inv_std)[None, :, None, None] \
        + beta[None, :, None, None]
    return jnp.maximum(y, 0.0)


if __name__ == "__main__":
    key = jax.random.PRNGKey(0)
    k_x, k_w, k_g, k_b, k_m, k_v = jax.random.split(key, 6)

    N, C_in, C_out, H, W = 2, 4, 8, 16, 16

    x = jax.random.normal(k_x, (N, C_in, H, W), dtype=jnp.float32)

    # Conv2d default-style init: uniform in [-1/sqrt(fan_in), 1/sqrt(fan_in)], fan_in = C_in*3*3.
    bound = 1.0 / (C_in * 9) ** 0.5
    weight = jax.random.uniform(k_w, (C_out, C_in, 3, 3), minval=-bound, maxval=bound,
                                dtype=jnp.float32)

    gamma = jax.random.uniform(k_g, (C_out,), minval=0.5, maxval=1.5, dtype=jnp.float32)
    beta = jax.random.uniform(k_b, (C_out,), minval=-0.5, maxval=0.5, dtype=jnp.float32)
    running_mean = 0.1 * jax.random.normal(k_m, (C_out,), dtype=jnp.float32)
    running_var = jax.random.uniform(k_v, (C_out,), minval=0.5, maxval=1.5, dtype=jnp.float32)

    out = conv_block_forward(x, weight, gamma, beta, running_mean, running_var)
    jax.block_until_ready(out)

    ref = _reference(x, weight, gamma, beta, running_mean, running_var)
    assert out.shape == (N, C_out, H, W)
    max_err = float(jnp.max(jnp.abs(out - ref)))
    assert jnp.allclose(out, ref, atol=1e-4, rtol=1e-4), max_err

    print("KERNEL_OK")
</pallas_src>

<mosaic_0001>
module attributes {stable_mosaic.version = 11 : i64} {
  func.func @_conv3x3_bn_relu_kernel(%arg0: i32, %arg1: memref<1x4x384xf32, #tpu.memory_space<vmem>>, %arg2: memref<8x36xf32, #tpu.memory_space<vmem>>, %arg3: memref<8x1xf32, #tpu.memory_space<vmem>>, %arg4: memref<8x1xf32, #tpu.memory_space<vmem>>, %arg5: memref<1x8x256xf32, #tpu.memory_space<vmem>>, %arg6: memref<36x256xf32, #tpu.memory_space<vmem>>) attributes {dimension_semantics = [#tpu.dimension_semantics<parallel>], iteration_bounds = array<i64: 2>, scalar_prefetch = 0 : i64, scratch_operands = 1 : i64, tpu.core_type = #tpu.core_type<tc>, window_params = [{transform_indices = @transform_0, window_bounds = array<i64: 1, 4, 384>}, {pipeline_mode = #tpu.pipeline_mode<synchronous>, transform_indices = @transform_1, window_bounds = array<i64: 8, 36>}, {pipeline_mode = #tpu.pipeline_mode<synchronous>, transform_indices = @transform_2, window_bounds = array<i64: 8, 1>}, {pipeline_mode = #tpu.pipeline_mode<synchronous>, transform_indices = @transform_3, window_bounds = array<i64: 8, 1>}, {transform_indices = @transform_4, window_bounds = array<i64: 1, 8, 256>}]} {
    %0 = tpu.iota {dimensions = array<i32: 1>} : vector<1x256xi32>
    %c16_i32 = arith.constant 16 : i32
    %c0_i32 = arith.constant 0 : i32
    %1 = arith.cmpi eq, %c16_i32, %c0_i32 : i32
    %c1_i32 = arith.constant 1 : i32
    %2 = arith.select %1, %c1_i32, %c16_i32 : i32
    %3 = vector.broadcast %2 : i32 to vector<1x256xi32>
    %4 = arith.remsi %0, %3 : vector<1x256xi32>
    %c0_i32_0 = arith.constant 0 : i32
    %5 = vector.broadcast %c0_i32_0 : i32 to vector<1x256xi32>
    %6 = arith.cmpi ne, %4, %5 : vector<1x256xi32>
    %c0_i32_1 = arith.constant 0 : i32
    %7 = vector.broadcast %c0_i32_1 : i32 to vector<1x256xi32>
    %8 = arith.cmpi slt, %4, %7 : vector<1x256xi32>
    %c0_i32_2 = arith.constant 0 : i32
    %9 = arith.cmpi slt, %2, %c0_i32_2 : i32
    %10 = vector.broadcast %9 : i1 to vector<1x256xi1>
    %11 = vector.broadcast %10 : vector<1x256xi1> to vector<1x256xi1>
    %12 = arith.xori %8, %11 : vector<1x256xi1>
    %13 = arith.andi %12, %6 : vector<1x256xi1>
    %14 = vector.broadcast %2 : i32 to vector<1x256xi32>
    %15 = arith.addi %4, %14 : vector<1x256xi32>
    %16 = arith.select %13, %15, %4 : vector<1x256xi1>, vector<1x256xi32>
    %c1_i32_3 = arith.constant 1 : i32
    %17 = vector.broadcast %c1_i32_3 : i32 to vector<1x256xi32>
    %18 = arith.cmpi sge, %16, %17 : vector<1x256xi32>
    %c14_i32 = arith.constant 14 : i32
    %19 = vector.broadcast %c14_i32 : i32 to vector<1x256xi32>
    %20 = arith.cmpi sle, %16, %19 : vector<1x256xi32>
    %c0 = arith.constant 0 : index
    %c0_4 = arith.constant 0 : index
    %c0_5 = arith.constant 0 : index
    %21 = vector.load %arg1[%c0, %c0_4, %c0_5] : memref<1x4x384xf32, #tpu.memory_space<vmem>>, vector<1x4x256xf32>
    %22 = vector.shape_cast %21 : vector<1x4x256xf32> to vector<4x256xf32>
    %cst = arith.constant 0.000000e+00 : f32
    %23 = vector.shape_cast %18 : vector<1x256xi1> to vector<1x256xi1>
    %24 = vector.broadcast %23 : vector<1x256xi1> to vector<4x256xi1>
    %25 = vector.broadcast %cst : f32 to vector<4x256xf32>
    %26 = arith.select %24, %22, %25 : vector<4x256xi1>, vector<4x256xf32>
    %c0_6 = arith.constant 0 : index
    %c0_7 = arith.constant 0 : index
    %27 = vector.load %arg6[%c0_6, %c0_7] : memref<36x256xf32, #tpu.memory_space<vmem>>, vector<4x256xf32>
    tpu.vector_store %arg6[%c0_6, %c0_7], %26 {strides = array<i32>} : memref<36x256xf32, #tpu.memory_space<vmem>>, vector<4x256xf32>,
    %c0_8 = arith.constant 0 : index
    %c0_9 = arith.constant 0 : index
    %c1 = arith.constant 1 : index
    %28 = vector.load %arg1[%c0_8, %c0_9, %c1] : memref<1x4x384xf32, #tpu.memory_space<vmem>>, vector<1x4x256xf32>
    %29 = vector.shape_cast %28 : vector<1x4x256xf32> to vector<4x256xf32>
    %c4 = arith.constant 4 : index
    %c0_10 = arith.constant 0 : index
    %30 = vector.load %arg6[%c4, %c0_10] : memref<36x256xf32, #tpu.memory_space<vmem>>, vector<4x256xf32>
    tpu.vector_store %arg6[%c4, %c0_10], %29 {strides = array<i32>} : memref<36x256xf32, #tpu.memory_space<vmem>>, vector<4x256xf32>,
    %c0_11 = arith.constant 0 : index
    %c0_12 = arith.constant 0 : index
    %c2 = arith.constant 2 : index
    %31 = vector.load %arg1[%c0_11, %c0_12, %c2] : memref<1x4x384xf32, #tpu.memory_space<vmem>>, vector<1x4x256xf32>
    %32 = vector.shape_cast %31 : vector<1x4x256xf32> to vector<4x256xf32>
    %cst_13 = arith.constant 0.000000e+00 : f32
    %33 = vector.shape_cast %20 : vector<1x256xi1> to vector<1x256xi1>
    %34 = vector.broadcast %33 : vector<1x256xi1> to vector<4x256xi1>
    %35 = vector.broadcast %cst_13 : f32 to vector<4x256xf32>
    %36 = arith.select %34, %32, %35 : vector<4x256xi1>, vector<4x256xf32>
    %c8 = arith.constant 8 : index
    %c0_14 = arith.constant 0 : index
    %37 = vector.load %arg6[%c8, %c0_14] : memref<36x256xf32, #tpu.memory_space<vmem>>, vector<4x256xf32>
    tpu.vector_store %arg6[%c8, %c0_14], %36 {strides = array<i32>} : memref<36x256xf32, #tpu.memory_space<vmem>>, vector<4x256xf32>,
    %c0_15 = arith.constant 0 : index
    %c0_16 = arith.constant 0 : index
    %c16 = arith.constant 16 : index
    %38 = vector.load %arg1[%c0_15, %c0_16, %c16] : memref<1x4x384xf32, #tpu.memory_space<vmem>>, vector<1x4x256xf32>
    %39 = vector.shape_cast %38 : vector<1x4x256xf32> to vector<4x256xf32>
    %cst_17 = arith.constant 0.000000e+00 : f32
    %40 = vector.shape_cast %18 : vector<1x256xi1> to vector<1x256xi1>
    %41 = vector.broadcast %40 : vector<1x256xi1> to vector<4x256xi1>
    %42 = vector.broadcast %cst_17 : f32 to vector<4x256xf32>
    %43 = arith.select %41, %39, %42 : vector<4x256xi1>, vector<4x256xf32>
    %c12 = arith.constant 12 : index
    %c0_18 = arith.constant 0 : index
    %44 = vector.load %arg6[%c12, %c0_18] : memref<36x256xf32, #tpu.memory_space<vmem>>, vector<4x256xf32>
    tpu.vector_store %arg6[%c12, %c0_18], %43 {strides = array<i32>} : memref<36x256xf32, #tpu.memory_space<vmem>>, vector<4x256xf32>,
    %c0_19 = arith.constant 0 : index
    %c0_20 = arith.constant 0 : index
    %c17 = arith.constant 17 : index
    %45 = vector.load %arg1[%c0_19, %c0_20, %c17] : memref<1x4x384xf32, #tpu.memory_space<vmem>>, vector<1x4x256xf32>
    %46 = vector.shape_cast %45 : vector<1x4x256xf32> to vector<4x256xf32>
    %c16_21 = arith.constant 16 : index
    %c0_22 = arith.constant 0 : index
    %47 = vector.load %arg6[%c16_21, %c0_22] : memref<36x256xf32, #tpu.memory_space<vmem>>, vector<4x256xf32>
    tpu.vector_store %arg6[%c16_21, %c0_22], %46 {strides = array<i32>} : memref<36x256xf32, #tpu.memory_space<vmem>>, vector<4x256xf32>,
    %c0_23 = arith.constant 0 : index
    %c0_24 = arith.constant 0 : index
    %c18 = arith.constant 18 : index
    %48 = vector.load %arg1[%c0_23, %c0_24, %c18] : memref<1x4x384xf32, #tpu.memory_space<vmem>>, vector<1x4x256xf32>
    %49 = vector.shape_cast %48 : vector<1x4x256xf32> to vector<4x256xf32>
    %cst_25 = arith.constant 0.000000e+00 : f32
    %50 = vector.shape_cast %20 : vector<1x256xi1> to vector<1x256xi1>
    %51 = vector.broadcast %50 : vector<1x256xi1> to vector<4x256xi1>
    %52 = vector.broadcast %cst_25 : f32 to vector<4x256xf32>
    %53 = arith.select %51, %49, %52 : vector<4x256xi1>, vector<4x256xf32>
    %c20 = arith.constant 20 : index
    %c0_26 = arith.constant 0 : index
    %54 = vector.load %arg6[%c20, %c0_26] : memref<36x256xf32, #tpu.memory_space<vmem>>, vector<4x256xf32>
    tpu.vector_store %arg6[%c20, %c0_26], %53 {strides = array<i32>} : memref<36x256xf32, #tpu.memory_space<vmem>>, vector<4x256xf32>,
    %c0_27 = arith.constant 0 : index
    %c0_28 = arith.constant 0 : index
    %c32 = arith.constant 32 : index
    %55 = vector.load %arg1[%c0_27, %c0_28, %c32] : memref<1x4x384xf32, #tpu.memory_space<vmem>>, vector<1x4x256xf32>
    %56 = vector.shape_cast %55 : vector<1x4x256xf32> to vector<4x256xf32>
    %cst_29 = arith.constant 0.000000e+00 : f32
    %57 = vector.shape_cast %18 : vector<1x256xi1> to vector<1x256xi1>
    %58 = vector.broadcast %57 : vector<1x256xi1> to vector<4x256xi1>
    %59 = vector.broadcast %cst_29 : f32 to vector<4x256xf32>
    %60 = arith.select %58, %56, %59 : vector<4x256xi1>, vector<4x256xf32>
    %c24 = arith.constant 24 : index
    %c0_30 = arith.constant 0 : index
    %61 = vector.load %arg6[%c24, %c0_30] : memref<36x256xf32, #tpu.memory_space<vmem>>, vector<4x256xf32>
    tpu.vector_store %arg6[%c24, %c0_30], %60 {strides = array<i32>} : memref<36x256xf32, #tpu.memory_space<vmem>>, vector<4x256xf32>,
    %c0_31 = arith.constant 0 : index
    %c0_32 = arith.constant 0 : index
    %c33 = arith.constant 33 : index
    %62 = vector.load %arg1[%c0_31, %c0_32, %c33] : memref<1x4x384xf32, #tpu.memory_space<vmem>>, vector<1x4x256xf32>
    %63 = vector.shape_cast %62 : vector<1x4x256xf32> to vector<4x256xf32>
    %c28 = arith.constant 28 : index
    %c0_33 = arith.constant 0 : index
    %64 = vector.load %arg6[%c28, %c0_33] : memref<36x256xf32, #tpu.memory_space<vmem>>, vector<4x256xf32>
    tpu.vector_store %arg6[%c28, %c0_33], %63 {strides = array<i32>} : memref<36x256xf32, #tpu.memory_space<vmem>>, vector<4x256xf32>,
    %c0_34 = arith.constant 0 : index
    %c0_35 = arith.constant 0 : index
    %c34 = arith.constant 34 : index
    %65 = vector.load %arg1[%c0_34, %c0_35, %c34] : memref<1x4x384xf32, #tpu.memory_space<vmem>>, vector<1x4x256xf32>
    %66 = vector.shape_cast %65 : vector<1x4x256xf32> to vector<4x256xf32>
    %cst_36 = arith.constant 0.000000e+00 : f32
    %67 = vector.shape_cast %20 : vector<1x256xi1> to vector<1x256xi1>
    %68 = vector.broadcast %67 : vector<1x256xi1> to vector<4x256xi1>
    %69 = vector.broadcast %cst_36 : f32 to vector<4x256xf32>
    %70 = arith.select %68, %66, %69 : vector<4x256xi1>, vector<4x256xf32>
    %c32_37 = arith.constant 32 : index
    %c0_38 = arith.constant 0 : index
    %71 = vector.load %arg6[%c32_37, %c0_38] : memref<36x256xf32, #tpu.memory_space<vmem>>, vector<4x256xf32>
    tpu.vector_store %arg6[%c32_37, %c0_38], %70 {strides = array<i32>} : memref<36x256xf32, #tpu.memory_space<vmem>>, vector<4x256xf32>,
    %c0_39 = arith.constant 0 : index
    %c0_40 = arith.constant 0 : index
    %72 = vector.load %arg2[%c0_39, %c0_40] : memref<8x36xf32, #tpu.memory_space<vmem>>, vector<8x36xf32>
    %c0_41 = arith.constant 0 : index
    %c0_42 = arith.constant 0 : index
    %73 = vector.load %arg6[%c0_41, %c0_42] : memref<36x256xf32, #tpu.memory_space<vmem>>, vector<36x256xf32>
    %cst_43 = arith.constant dense<0.000000e+00> : vector<8x256xf32>
    %74 = tpu.matmul %72, %73, %cst_43 {dimension_numbers = #tpu.dot_dimension_numbers<[1], [0], [0], [1], [0, 0, 1, 1], [], []>} : vector<8x36xf32>, vector<36x256xf32>, vector<8x256xf32> -> vector<8x256xf32>
    %c0_44 = arith.constant 0 : index
    %c0_45 = arith.constant 0 : index
    %75 = vector.load %arg3[%c0_44, %c0_45] : memref<8x1xf32, #tpu.memory_space<vmem>>, vector<8x1xf32>
    %76 = vector.broadcast %75 : vector<8x1xf32> to vector<8x256xf32>
    %77 = arith.mulf %74, %76 : vector<8x256xf32>
    %c0_46 = arith.constant 0 : index
    %c0_47 = arith.constant 0 : index
    %78 = vector.load %arg4[%c0_46, %c0_47] : memref<8x1xf32, #tpu.memory_space<vmem>>, vector<8x1xf32>
    %79 = vector.broadcast %78 : vector<8x1xf32> to vector<8x256xf32>
    %80 = arith.addf %77, %79 : vector<8x256xf32>
    %cst_48 = arith.constant 0.000000e+00 : f32
    %81 = vector.broadcast %cst_48 : f32 to vector<8x256xf32>
    %82 = arith.maximumf %80, %81 : vector<8x256xf32>
    %c0_49 = arith.constant 0 : index
    %c0_50 = arith.constant 0 : index
    %c0_51 = arith.constant 0 : index
    %83 = vector.load %arg5[%c0_49, %c0_50, %c0_51] : memref<1x8x256xf32, #tpu.memory_space<vmem>>, vector<1x8x256xf32>
    %84 = vector.shape_cast %83 : vector<1x8x256xf32> to vector<8x256xf32>
    %85 = vector.shape_cast %82 : vector<8x256xf32> to vector<1x8x256xf32>
    tpu.vector_store %arg5[%c0_49, %c0_50, %c0_51], %85 {strides = array<i32>} : memref<1x8x256xf32, #tpu.memory_space<vmem>>, vector<1x8x256xf32>,
    return
  }
  func.func @transform_0(%arg0: i32) -> (i32, i32, i32) {
    %c0_i32 = arith.constant 0 : i32
    %c0_i32_0 = arith.constant 0 : i32
    %c0_i32_1 = arith.constant 0 : i32
    return %arg0, %c0_i32, %c0_i32_0 : i32, i32, i32
  }
  func.func @transform_1(%arg0: i32) -> (i32, i32) {
    %c0_i32 = arith.constant 0 : i32
    %c0_i32_0 = arith.constant 0 : i32
    %c0_i32_1 = arith.constant 0 : i32
    return %c0_i32, %c0_i32_0 : i32, i32
  }
  func.func @transform_2(%arg0: i32) -> (i32, i32) {
    %c0_i32 = arith.constant 0 : i32
    %c0_i32_0 = arith.constant 0 : i32
    %c0_i32_1 = arith.constant 0 : i32
    return %c0_i32, %c0_i32_0 : i32, i32
  }
  func.func @transform_3(%arg0: i32) -> (i32, i32) {
    %c0_i32 = arith.constant 0 : i32
    %c0_i32_0 = arith.constant 0 : i32
    %c0_i32_1 = arith.constant 0 : i32
    return %c0_i32, %c0_i32_0 : i32, i32
  }
  func.func @transform_4(%arg0: i32) -> (i32, i32, i32) {
    %c0_i32 = arith.constant 0 : i32
    %c0_i32_0 = arith.constant 0 : i32
    %c0_i32_1 = arith.constant 0 : i32
    return %arg0, %c0_i32, %c0_i32_0 : i32, i32, i32
  }
}

</mosaic_0001>

<bundles_post_ra>
// kernel: tpu_custom_call.1
= control target key start
LH: loop header
LB: loop body
LE: loop exit
PB: predicated region body
PF: predicated region fallthrough
CT: control target
= control target key end

     0   :  { %9 = vsyncpa [#allocation4], 0  ;;  %s1037_s0 = inlined_call_operand.hbm [shape: f32[2,4,384], index: 0, kind: input, shape index: {}]   ;;  %s1038_s1 = inlined_call_operand.vmem [shape: f32[8,36], index: 1, kind: input, shape index: {}]   ;;  %s1039_s2 = inlined_call_operand.vmem [shape: f32[8,1], index: 2, kind: input, shape index: {}]   ;;  %s1040_s3 = inlined_call_operand.vmem [shape: f32[8,1], index: 3, kind: input, shape index: {}]   ;;  %s1041_s4 = inlined_call_operand.hbm [shape: f32[2,8,256], index: 4, kind: output, shape index: {}]  }
   0x1   :  { %11 = vsyncpa [#allocation4 + $0x1], 0 }
   0x2   :  { %12 = vsyncpa [#allocation5], 0 }
   0x3   :  { %14 = vsyncpa [#allocation5 + $0x1], 0  ;;  %s838_s15 = smov 0   ;;  %s840_s16 = smov 0  }
   0x4   :  { %s842_s17 = smov 0   ;;  %s844_s18 = smov 0  }
   0x5 LB: > { %s859_s19 = sadd.s32 4294967295, %s799_s18   ;;  %s627_s20 = sadd.s32 4294967294, %s799_s18   ;;  %s799_s18 = sphi %s844_s18, %s1065_s18   ;;  %s795_s17 = sphi %s842_s17, %s1064_s17   ;;  %s791_s16 = sphi %s840_s16, %s1063_s16   ;;  %s787_s15 = sphi %s838_s15, %s1062_s15  }
   0x6   : > { %s863_s21 = sadd.s32 1, %s799_s18   ;;  %s27_s22 = sadd.s32 1, %s795_s17 }
   0x7   : > { %s24_s23 = ssub.s32 %s799_s18, %s863_s21  ;;  %p34_p0 = scmp.ne.s32.totalorder %s795_s17, %s791_s16 }
   0x8   : > { %p25_p1 = scmp.eq.s32.totalorder %s24_s23, 0  ;;  %p35_p2 = scmp.eq.s32.totalorder %s799_s18, 0 }
   0x9   : > { %p40_p3 = scmp.ne.s32.totalorder %s791_s16, %s787_s15  ;;  %p41_p4 = scmp.eq.s32.totalorder %s859_s19, 0 }
   0xa   : > { %s875_s24 = scalar_select %p25_p1, %s795_s17, %s27_s22  }
   0xb   : > { %p36_p5 = por %p35_p2, %p34_p0  ;;  %p877_p6 = por %p41_p4, %p40_p3 }
   0xc   : > { %p127_p7 = scmp.eq.s32.totalorder %s859_s19, 1  ;;  %p133_p8 = scmp.eq.s32.totalorder %s627_s20, 1 }
   0xd   : > { %s1044_s25 = scalar_select %p877_p6, 1, 0 }
   0xe   : > { %p657_p10 = scmp.lt.s32.totalorder %s799_s18, 2  ;;  %p884_p11 = por %p127_p7, %p34_p0 }
   0xf   : > { %p888_p12 = por %p133_p8, %p40_p3  ;;  %s162_s28 = sand.u32 1, %s795_s17  }
  0x10   : > { %s1045_s26 = scalar_select %p884_p11, 1, 0 }
  0x11   : > { %s1046_s27 = scalar_select %p888_p12, 1, 0 }
  0x12   : > { %s643_s29 = smul.u32 192, %s799_s18  ;;  %p899_p13 = pnand %p657_p10, %p36_p5 }
  0x13   : > { %s642_s30 = smul.u32 12, %s162_s28  ;;  %s163_s11 = scalar_lea.sflag [#allocation4], %s162_s28 }
  0x14   : > { %s897_s7 = scalar_lea.hbm %s1037_s0, %s643_s29  ;;  %p709_p3 = pneg %p899_p13 }
  0x15   : > { %s166_s9 = scalar_lea.vmem [#allocation3], %s642_s30  ;;  %s707_s12 = scalar_lea.hbm %s897_s7, 192 }
  0x16   : > { %s174_s10 = sshll.u32 %s166_s9, 4  ;;  %p708_p2 = scmp.ne.s32.totalorder %s897_s7, %s707_s12  ;;  %s175_s10 = int_to_ptr.vmem [resolvable:$true] %s174_s10 }
  0x17   : > { %s712_s20 = scalar_lea.hbm %s1037_s0, 384  ;;  %p713_p5 = scmp.lt.s32.totalorder %s897_s7, %s1037_s0 }
  0x18   : > { %p710_p4 = pnand %p709_p3, %p708_p2  ;;  %p714_p8 = scmp.lt.s32.totalorder %s712_s20, %s707_s12 }
  0x1a   : > { %p711_p7 = pneg %p710_p4  ;;  %p715_p10 = por %p714_p8, %p713_p5 }
  0x1c   : > { %p716_p9 = pnand %p715_p10, %p711_p7 }
  0x1e   : > { %719 = shalt.err (!%p716_p9)
}
  0x1f   : > { %s720_s29 = scalar_lea.vmem %s175_s10, 192  ;;  %s801_s28 = smov [#allocation3]  }
  0x20   : > { %p721_p0 = scmp.ne.s32.totalorder %s175_s10, %s720_s29  ;;  %s725_s30 = sshll.u32 %s801_s28, 4  ;;  %s726_s30 = int_to_ptr.vmem [resolvable:$false] %s725_s30 }
  0x21   : > { %s727_s5 = scalar_lea.vmem %s726_s30, 384  ;;  %p728_p2 = scmp.lt.s32.totalorder %s175_s10, %s726_s30 }
  0x22   : > { %p723_p1 = pnand %p721_p0, %p709_p3  ;;  %p729_p4 = scmp.lt.s32.totalorder %s727_s5, %s720_s29 }
  0x24   : > { %p724_p12 = pneg %p723_p1  ;;  %p730_p11 = por %p729_p4, %p728_p2 }
  0x26   : > { %p731_p6 = pnand %p730_p11, %p724_p12 }
  0x28   : > { %734 = shalt.err (!%p731_p6)
}
  0x29   : > { %652 = dma.hbm_to_vmem [thread:$0]  (!%p899_p13), %s897_s7, 192, %s175_s10, %s163_s11  }
  0x2a   : > { %p1048_p9 = scmp.lt.s32.totalorder %s799_s18, 3  ;;  %p1049_p7 = scmp.ge.s32.totalorder %s799_s18, 1 }
  0x2c   : > { %p180_p5 = pnand %p1049_p7, %p1048_p9 }
  0x2d   : > { %s924_s6 = sand.u32 (!%p180_p5), 1, %s791_s16   ;;  %p1050_p6 = scmp.ne.s32.totalorder (!%p180_p5), %s1044_s25, 0 }
  0x2e   : > { %183 = sbr.rel (%p180_p5) target bundleno = 437 (0x1b5), region = 36  ;;  %s186_s12 = scalar_lea.sflag (!%p180_p5), [#allocation4], %s924_s6 }
  0x2f   : > { %s644_s9 = smul.u32 (!%p180_p5), 12, %s924_s6 }
  0x31   : > { %s928_s13 = scalar_lea.vmem (!%p180_p5), [#allocation3], %s644_s9 }
  0x33   : > { %778 = dma.done.wait (%p1050_p6), %s186_s12, 192  }
  0x34   : > { %780 = vsyncadd (%p1050_p6), %s186_s12, 4294967104  ;;  %v214_v0 = vlaneseq  ;;  %v410_v3 = vld [vmem:[%s928_s13 + $0x8] sm:$0xf]  ;;  %v409_v4 = vld [vmem:[%s928_s13] sm:$0xff]  ;;  %s802_s7 = smov 94   ;;  %s803_s25 = smov 110  }
  0x35   : > { %418 = vrot.lane.b32.xlu0 %v410_v3, %s802_s7  ;;  %414 = vrot.lane.b32.xlu1 %v409_v4, %s802_s7  ;;  %v413_v5 = vcombine.high %v409_v4, %v409_v4  ;;  %v345_v7 = vld [vmem:[%s928_s13 + $0x8] sm:$0xf]  ;;  %s804_s8 = smov 96   ;;  %s805_s10 = smov 95   ;;  %v394_v15 = vcombine.low %v409_v4, %v409_v4  ;;  %v810_v20 = vmov 0.0   ;;  %v811_v21 = vmov 0  }
  0x36   : > { %v934_v1 = vand.u32 127, %v214_v0  ;;  %v371_v13 = vld [vmem:[%s928_s13 + $0x8] sm:$0xf]  ;;  %s806_s11 = smov 112   ;;  %s807_s14 = smov 111   ;;  %515 = vmatprep.mubr.f32.mxu0 %v810_v20  ;;  %701 = vset.pattern.permute.xlu0 %v811_v21  ;;  %vm355_vm2 = vcmask 900096  }
  0x37   : > { %v705_v14 = vld [vmem:[%s928_s13 + $0x8] ss:$0 sps:$4 sm:$0xff]   ;;  %s808_s20 = smov 126   ;;  %s809_s22 = smov 127   ;;  %702 = vset.pattern.permute.xlu1 %v811_v21  ;;  %vm420_vm4 = vcmask 769024   ;;  %vm381_vm6 = vcmask 785408  }
  0x38   : > { %v937_v2 = vadd.s32 128, %v934_v1  ;;  %v221_v8 = vand.u32 15, %v934_v1  ;;  %v301_v16 = vld [vmem:[%s928_s13 + $0x8] sm:$0xf]  ;;  %vm444_vm7 = vcmask 1043456   ;;  %vm402_vm8 = vcmask 777216  }
  0x39   : > { %353 = vrot.lane.b32.xlu0 %v345_v7, %s803_s25  ;;  %351 = vrot.lane.b32.xlu1 %v413_v5, %s803_s25  ;;  %v327_v17 = vld [vmem:[%s928_s13 + $0x8] sm:$0xf]  ;;  %vm311_vm9 = vcmask 916480   ;;  %vm337_vm10 = vcmask 908288   ;;  %vm291_vm11 = vcmask 1031168   ;;  %vm269_vm12 = vcmask 1039360  }
  0x3a   : > { %v228_v6 = vand.u32 15, %v937_v2  ;;  %vm950_vm1 = vcmp.ge.s32.totalorder %v221_v8, 1  ;;  %v277_v18 = vld [vmem:[%s928_s13 + $0x8] sm:$0xf]  ;;  %vm975_vm5 = vcmp.le.s32.totalorder %v221_v8, 14  ;;  %vm440_vm13 = vcmask 293888  }
  0x3b   : > { %v253_v12 = vsel %vm950_vm1, %v409_v4, 0.0  ;;  %v706_v19 = vld [vmem:[%s928_s13 + $0x8] ss:$0 sps:$4 sm:$0xff]   ;;  %s632_s12 = sshll.u32 %s924_s6, 4  ;;  %s641_s13 = sshll.u32 %s859_s19, 8 }
  0x3c   : > { %vm944_vm0 = vcmp.ge.s32.totalorder %v228_v6, 1  ;;  %255 = vst [vmem:[#allocation2 + $0x30] sm:$0xf] %v253_v12  ;;  %v522_v22 = vld [vmem:[%s1039_s2] sm:$0xff]  ;;  %vm968_vm3 = vcmp.le.s32.totalorder %v228_v6, 14  ;;  %p1059_p12 = scmp.ne.s32.totalorder %s1045_s26, 0 }
  0x3d   : > { %v254_v10 = vsel %vm944_vm0, %v413_v5, 0.0  ;;  %416 = vrot.lane.b32.xlu0 %v413_v5, %s802_s7  ;;  %377 = vrot.lane.b32.xlu1 %v413_v5, %s804_s8  ;;  %v530_v23 = vld [vmem:[%s1040_s3] sm:$0xff]  ;;  %s213_s7 = scalar_lea.vmem [#allocation6], %s632_s12 }
  0x3e   : > { %256 = vst [vmem:[#allocation2] sm:$0xf] %v254_v10  ;;  %v429_v26 = vld [vmem:[%s1038_s1] sm:$0xff] }
  0x41   : > { %379 = vrot.lane.b32.xlu0 %v371_v13, %s804_s8  ;;  %349 = vrot.lane.b32.xlu1 %v409_v4, %s803_s25  ;;  %s557_s25 = sshll.u32 %s213_s7, 4  ;;  %s558_s25 = int_to_ptr.vmem [resolvable:$true] %s557_s25 }
  0x45   : > { %375 = vrot.lane.b32.xlu0 %v409_v4, %s804_s8  ;;  %398 = vrot.lane.b32.xlu1 %v409_v4, %s805_s10 }
  0x49   : > { %400 = vrot.lane.b32.xlu0 %v705_v14, %s805_s10  ;;  %307 = vrot.lane.b32.xlu1 %v413_v5, %s806_s11 }
  0x4d   : > { %309 = vrot.lane.b32.xlu0 %v301_v16, %s806_s11  ;;  %396 = vrot.lane.b32.xlu1 %v394_v15, %s805_s10 }
  0x51   : > { %305 = vrot.lane.b32.xlu0 %v409_v4, %s806_s11  ;;  %333 = vrot.lane.b32.xlu1 %v413_v5, %s807_s14  ;;  %s555_s11 = scalar_lea.hbm %s1041_s4, %s641_s13 }
  0x55   : > { %335 = vrot.lane.b32.xlu0 %v327_v17, %s807_s14  ;;  %287 = vrot.lane.b32.xlu1 %v413_v5, %s808_s20 }
  0x59   : > { %289 = vrot.lane.b32.xlu0 %v277_v18, %s808_s20  ;;  %331 = vrot.lane.b32.xlu1 %v409_v4, %s807_s14  ;;  %s543_s14 = scalar_lea.sflag [#allocation5], %s924_s6 }
  0x5d   : > { %285 = vrot.lane.b32.xlu0 %v409_v4, %s808_s20  ;;  %265 = vrot.lane.b32.xlu1 %v409_v4, %s809_s22  ;;  %s735_s20 = scalar_lea.vmem %s558_s25, 256 }
  0x5e   : > { %p736_p11 = scmp.ne.s32.totalorder %s558_s25, %s735_s20 }
  0x60   : > { %p737_p13 = pnand %p736_p11, %p1059_p12 }
  0x61   : > { %267 = vrot.lane.b32.xlu0 %v706_v19, %s809_s22  ;;  %263 = vrot.lane.b32.xlu1 %v394_v15, %s809_s22  ;;  %s812_s22 = smov [#allocation6]  }
  0x62   : > { %p738_p0 = pneg %p737_p13  ;;  %s739_s19 = sshll.u32 %s812_s22, 4  ;;  %s740_s19 = int_to_ptr.vmem [resolvable:$false] %s739_s19 }
  0x63   : > { %s741_s23 = scalar_lea.vmem %s740_s19, 512  ;;  %p742_p1 = scmp.lt.s32.totalorder %s558_s25, %s740_s19 }
  0x64   : > { %p743_p3 = scmp.lt.s32.totalorder %s741_s23, %s735_s20 }
  0x65   : > { %525 = vperm.xlu0 %701, %v522_v22   ;;  %533 = vperm.xlu1 %702, %v530_v23  }
  0x66   : > { %p744_p8 = por %p743_p3, %p742_p1 }
  0x68   : > { %p745_p10 = pnand %p744_p8, %p738_p0 }
  0xa7   : > { %v419_v24 = vpop.permute.xlu0 %418  ;;  %v415_v25 = vpop.permute.xlu1 %414 }
  0xab   : > { %v354_v27 = vpop.permute.xlu0 %353  ;;  %v352_v28 = vpop.permute.xlu1 %351 }
  0xac   : > { %v357_v29 = vsel %vm355_vm2, %v352_v28, %v354_v27 }
  0xad   : > { %v361_v30 = vsel %vm968_vm3, %v357_v29, 0.0 }
  0xae   : > { %v365_v31 = vrot.slane %v361_v30, 4 }
  0xaf   : > { %v417_v33 = vpop.permute.xlu0 %416  ;;  %v378_v34 = vpop.permute.xlu1 %377 }
  0xb0   : > { %369 = vst [vmem:[#allocation2 + $0x28] sm:$0xf0] %v365_v31  ;;  %v421_v35 = vsel %vm420_vm4, %v415_v25, %v417_v33  ;;  %v422_v36 = vsel %vm420_vm4, %v417_v33, %v419_v24 }
  0xb1   : > { %v425_v37 = vsel %vm975_vm5, %v421_v35, 0.0  ;;  %v426_v38 = vsel %vm968_vm3, %v422_v36, 0.0 }
  0xb2   : > { %427 = vst [vmem:[#allocation2 + $0x40] sm:$0xf] %v425_v37  ;;  %428 = vst [vmem:[#allocation2 + $0x38] sm:$0xf] %v426_v38 }
  0xb3   : > { %v380_v39 = vpop.permute.xlu0 %379  ;;  %v350_v40 = vpop.permute.xlu1 %349 }
  0xb4   : > { %v383_v41 = vsel %vm381_vm6, %v378_v34, %v380_v39  ;;  %v356_v42 = vsel %vm355_vm2, %v350_v40, %v352_v28 }
  0xb5   : > { %v387_v43 = vsel %vm944_vm0, %v383_v41, 0.0  ;;  %v360_v44 = vsel %vm975_vm5, %v356_v42, 0.0 }
  0xb6   : > { %389 = vst [vmem:[#allocation2 + $0x20] sm:$0xf] %v387_v43  ;;  %v364_v45 = vrot.slane %v360_v44, 4 }
  0xb7   : > { %v376_v46 = vpop.permute.xlu0 %375  ;;  %v399_v47 = vpop.permute.xlu1 %398 }
  0xb8   : > { %368 = vst [vmem:[#allocation2 + $0x48] sm:$0xf0] %v364_v45  ;;  %v382_v48 = vsel %vm381_vm6, %v376_v46, %v378_v34 }
  0xb9   : > { %v386_v49 = vsel %vm950_vm1, %v382_v48, 0.0  ;;  %v439_v50 = vld [vmem:[#allocation2 + $0x38] sm:$0xf]  ;;  %v438_v51 = vld [vmem:[#allocation2 + $0x40] sm:$0xf] }
  0xba   : > { %388 = vst [vmem:[#allocation2 + $0x8] sm:$0xf] %v386_v49  ;;  %633 = vmatprep.subr.msk.mxu0 %vm444_vm7, %v439_v50 }
  0xbb   : > { %634 = vmatpush1.msk.msra.mxu0 %vm444_vm7, %v438_v51  ;;  %v401_v52 = vpop.permute.xlu0 %400  ;;  %v308_v53 = vpop.permute.xlu1 %307 }
  0xbc   : > { %v404_v54 = vsel %vm402_vm8, %v399_v47, %v401_v52 }
  0xbd   : > { %408 = vst [vmem:[#allocation2 + $0x20] sm:$0xf0] %v404_v54 }
  0xbf   : > { %v310_v55 = vpop.permute.xlu0 %309  ;;  %v397_v56 = vpop.permute.xlu1 %396 }
  0xc0   : > { %v313_v57 = vsel %vm311_vm9, %v308_v53, %v310_v55  ;;  %v403_v58 = vsel %vm402_vm8, %v397_v56, %v399_v47 }
  0xc1   : > { %v317_v59 = vsel %vm944_vm0, %v313_v57, 0.0  ;;  %407 = vst [vmem:[#allocation2 + $0x8] sm:$0xf0] %v403_v58 }
  0xc2   : > { %v321_v60 = vrot.slane %v317_v59, 4 }
  0xc3   : > { %v306_v61 = vpop.permute.xlu0 %305  ;;  %v334_v62 = vpop.permute.xlu1 %333 }
  0xc4   : > { %325 = vst [vmem:[#allocation2 + $0x10] sm:$0xf0] %v321_v60  ;;  %v312_v63 = vsel %vm311_vm9, %v306_v61, %v308_v53  ;;  %v437_v0 = vld [vmem:[#allocation2 + $0x20] sm:$0xff] }
  0xc5   : > { %v316_v1 = vsel %vm950_vm1, %v312_v63, 0.0  ;;  %475 = vmatprep.subr.mxu0 %v437_v0 }
  0xc6   : > { %v320_v2 = vrot.slane %v316_v1, 4 }
  0xc7   : > { %v336_v3 = vpop.permute.xlu0 %335  ;;  %v288_v4 = vpop.permute.xlu1 %287 }
  0xc8   : > { %324 = vst [vmem:[#allocation2 + $0x18] sm:$0xf0] %v320_v2  ;;  %v339_v5 = vsel %vm337_vm10, %v334_v62, %v336_v3  ;;  %v436_v6 = vld [vmem:[#allocation2 + $0x8] sm:$0xff] }
  0xc9   : > { %343 = vst [vmem:[#allocation2 + $0x28] sm:$0xf] %v339_v5  ;;  %476 = vmatpush1.msra.mxu0 %v436_v6 }
  0xcb   : > { %v290_v7 = vpop.permute.xlu0 %289  ;;  %v332_v8 = vpop.permute.xlu1 %331 }
  0xcc   : > { %v293_v9 = vsel %vm291_vm11, %v288_v4, %v290_v7  ;;  %v338_v10 = vsel %vm337_vm10, %v332_v8, %v334_v62 }
  0xcd   : > { %v297_v12 = vsel %vm968_vm3, %v293_v9, 0.0  ;;  %342 = vst [vmem:[#allocation2 + $0x48] sm:$0xf] %v338_v10 }
  0xce   : > { %299 = vst [vmem:[#allocation2 + $0x10] sm:$0xf] %v297_v12 }
  0xcf   : > { %v286_v11 = vpop.permute.xlu0 %285  ;;  %v266_v13 = vpop.permute.xlu1 %265 }
  0xd0   : > { %v292_v14 = vsel %vm291_vm11, %v286_v11, %v288_v4  ;;  %v435_v15 = vld [vmem:[#allocation2 + $0x28] sm:$0xff] }
  0xd1   : > { %v296_v16 = vsel %vm975_vm5, %v292_v14, 0.0  ;;  %477 = vmatprep.subr.mxu0 %v435_v15 }
  0xd2   : > { %298 = vst [vmem:[#allocation2 + $0x18] sm:$0xf] %v296_v16 }
  0xd3   : > { %v268_v17 = vpop.permute.xlu0 %267  ;;  %v264_v18 = vpop.permute.xlu1 %263 }
  0xd4   : > { %v271_v19 = vsel %vm269_vm12, %v266_v13, %v268_v17  ;;  %v270_v20 = vsel %vm269_vm12, %v264_v18, %v266_v13  ;;  %v434_v21 = vld [vmem:[#allocation2 + $0x48] sm:$0xff] }
  0xd5   : > { %275 = vst [vmem:[#allocation2] sm:$0xf0] %v271_v19  ;;  %274 = vst [vmem:[#allocation2 + $0x30] sm:$0xf0] %v270_v20  ;;  %478 = vmatpush1.msra.mxu0 %v434_v21  ;;  %v433_v22 = vld [vmem:[#allocation2 + $0x10] sm:$0xff] }
  0xd6   : > { %479 = vmatprep.subr.mxu0 %v433_v22 }
  0xd9   : > { %v432_v23 = vld [vmem:[#allocation2 + $0x18] sm:$0xff] }
  0xda   : > { %480 = vmatpush1.msra.mxu0 %v432_v23 }
  0xdc   : > { %v431_v24 = vld [vmem:[#allocation2] sm:$0xff]  ;;  %v430_v25 = vld [vmem:[#allocation2 + $0x30] sm:$0xff] }
  0xdd   : > { %481 = vmatprep.subr.mxu0 %v431_v24 }
  0xde   : > { %482 = vmatpush1.msra.mxu0 %v430_v25 }
  0xdf   : > { %635 = vmatmul.mubr.msk.f32.vlgmr.msra.gmra.mxu0 %vm440_vm13, %v429_v26 }
  0xe0   : > { %v526_v27 = vpop.permute.xlu0 %525  ;;  %v534_v29 = vpop.permute.xlu1 %533 }
 0x19f   : > { %v517_v28 = vpop.f32.mrf.mxu0 }
 0x1a0   : > { %v528_v30 = vmul.f32 %v526_v27, %v517_v28 }
 0x1a1   : > { %v519_v31 = vpop.f32.mrf.mxu0 }
 0x1a2   : > { %v536_v32 = vadd.f32 %v534_v29, %v528_v30  ;;  %v529_v33 = vmul.f32 %v526_v27, %v519_v31 }
 0x1a4   : > { %v538_v34 = vmax.f32 %v536_v32, 0.0  ;;  %v537_v35 = vadd.f32 %v534_v29, %v529_v33 }
 0x1a6   : > { %540 = vst [vmem:[%s213_s7] sm:$0xff] %v538_v34  ;;  %v539_v36 = vmax.f32 %v537_v35, 0.0 }
 0x1a8   : > { %541 = vst [vmem:[%s213_s7 + $0x8] sm:$0xff] %v539_v36 }
 0x1a9   : > { %748 = shalt.err (!%p745_p10)
}
 0x1aa   : > { %s749_s29 = scalar_lea.hbm %s555_s11, 256  ;;  %s753_s30 = scalar_lea.hbm %s1041_s4, 512 }
 0x1ab   : > { %p750_p2 = scmp.ne.s32.totalorder %s555_s11, %s749_s29  ;;  %p754_p7 = scmp.lt.s32.totalorder %s555_s11, %s1041_s4 }
 0x1ac   : > { %p755_p5 = scmp.lt.s32.totalorder %s753_s30, %s749_s29 }
 0x1ad   : > { %p751_p4 = pnand %p750_p2, %p1059_p12 }
 0x1ae   : > { %p756_p6 = por %p755_p5, %p754_p7 }
 0x1af   : > { %p752_p9 = pneg %p751_p4 }
 0x1b1   : > { %p757_p11 = pnand %p756_p6, %p752_p9 }
 0x1b3   : > { %760 = shalt.err (!%p757_p11)
}
 0x1b4   : > { %647 = dma.vmem_to_hbm [thread:$0]  (%p1059_p12), %s558_s25, 256, %s555_s11, %s543_s14  }
 0x1b5 PF: > { %s569_s12 = sand.u32 1, %s787_s15   ;;  %p1060_p13 = scmp.ne.s32.totalorder %s1046_s27, 0 }
 0x1b6   : > { %p1061_p0 = scmp.ge.s32.totalorder %s799_s18, 2  ;;  %s570_s13 = scalar_lea.sflag [#allocation5], %s569_s12 }
 0x1b8   : > { %p654_p1 = pnand %p1061_p0, %p1060_p13 }
 0x1ba   : > { %p655_p3 = pneg %p654_p1 }
 0x1bc   : > { %782 = dma.done.wait (%p655_p3), %s570_s13, 256  }
 0x1bd   : > { %784 = vsyncadd (%p655_p3), %s570_s13, 4294967040  ;;  %p17_p8 = scmp.ge.s32.totalorder %s863_s21, 4   ;;  %s1062_s15 = smov %s791_s16 }
 0x1be   : > { %s1063_s16 = smov %s795_s17  ;;  %s1064_s17 = smov %s875_s24 }
 0x1bf   : > { %s1065_s18 = smov %s863_s21  ;;  %19 = sbr.rel (!%p17_p8) target bundleno = 5 (0x5), region = 81 }
 0x1c4   :  { %575 = vsyncpa [#allocation4], 1 }
 0x1c5   :  { %577 = vsyncpa [#allocation4 + $0x1], 1 }
 0x1c6   :  { %578 = vsyncpa [#allocation5], 1 }
 0x1c7   :  { %580 = vsyncpa [#allocation5 + $0x1], 1 }

</bundles_post_ra>
